<compile_context>
chip_gen: v6e
topology: v6e:2x2x1
jax: 0.10.0
libtpu: 0.0.40
codegen_flags: <defaults>
</compile_context>

<pallas_src>
import jax
import jax.numpy as jnp
from jax.experimental import pallas as pl
from jax.experimental.pallas import tpu as pltpu

HIDDEN = 256
_TB_MAX = 2048  # padded VMEM at this tile is ~14 MiB -> fits v5e/v6e/v7x budgets


def _round_up(x, m):
    return (x + m - 1) // m * m


def _choose_batch_tile(B):
    """Batch tile size: large tiles to amortize per-step overhead, but split a
    single-tile batch in two once it's big enough that v7x's two TensorCores
    should both get a grid step."""
    if B > _TB_MAX:
        return _TB_MAX
    if B >= 1024:
        return _round_up(pl.cdiv(B, 2), 8)
    return B  # single full-array block (block dims == array dims)


def _critic_kernel(s_ref, a_ref, w1_ref, b1_ref, w2_ref, b2_ref, w3_ref,
                   b3_ref, o_ref):
    # fc1: concat fused in-kernel -> one bf16 MXU push, f32 accumulation.
    x = jnp.concatenate([s_ref[...], a_ref[...]], axis=-1)        # (TB, S+A) f32
    h1 = jnp.dot(x.astype(jnp.bfloat16), w1_ref[...],
                 preferred_element_type=jnp.float32) + b1_ref[...]
    h1 = jnp.maximum(h1, 0.0)                                     # ReLU (f32, VPU)

    # fc2: bf16 operands, f32 accumulation.
    h2 = jnp.dot(h1.astype(jnp.bfloat16), w2_ref[...],
                 preferred_element_type=jnp.float32) + b2_ref[...]
    h2 = jnp.maximum(h2, 0.0)                                     # ReLU (f32, VPU)

    # fc3 (256 -> 1), computed lane-major: (1,256) . (TB,256)^T -> (1, TB).
    # Rides the under-utilized MXU and yields a lane-dense row for the store.
    q = jax.lax.dot_general(
        w3_ref[...], h2,
        dimension_numbers=(((1,), (1,)), ((), ())),
        preferred_element_type=jnp.float32) + b3_ref[0]           # (1, TB)
    o_ref[...] = q[None].astype(o_ref.dtype)                      # (1, 1, TB)


def critic_forward(state, action, params):
    """Pallas forward: state (B, S), action (B, A) -> q (B, 1) float32."""
    B, S = state.shape
    A = action.shape[1]

    TB = _choose_batch_tile(B)
    G = pl.cdiv(B, TB)           # ragged tail handled by Pallas boundary masking

    out = pl.pallas_call(
        _critic_kernel,
        out_shape=jax.ShapeDtypeStruct((G, 1, TB), jnp.float32),
        grid=(G,),
        in_specs=[
            pl.BlockSpec((TB, S), lambda i: (i, 0)),               # state tile
            pl.BlockSpec((TB, A), lambda i: (i, 0)),               # action tile
            pl.BlockSpec((S + A, HIDDEN), lambda i: (0, 0)),       # w1 (resident)
            pl.BlockSpec((1, HIDDEN), lambda i: (0, 0)),           # b1
            pl.BlockSpec((HIDDEN, HIDDEN), lambda i: (0, 0)),      # w2 (resident)
            pl.BlockSpec((1, HIDDEN), lambda i: (0, 0)),           # b2
            pl.BlockSpec((1, HIDDEN), lambda i: (0, 0)),           # w3 row vector
            pl.BlockSpec(memory_space=pltpu.MemorySpace.SMEM),     # b3 scalar
        ],
        out_specs=pl.BlockSpec((1, 1, TB), lambda i: (i, 0, 0)),   # lane-dense
        compiler_params=pltpu.CompilerParams(
            dimension_semantics=("parallel",),
            vmem_limit_bytes=32 * 1024 * 1024,   # generous fixed cap; weights
                                                 # ~160 KiB, max tile ~14 MiB
        ),
    )(state, action, params["w1"], params["b1"], params["w2"], params["b2"],
      params["w3"], params["b3"])

    # (G, 1, TB) lane-major -> (B, 1); padded tail rows are sliced off.
    return out.reshape(-1)[:B].reshape(B, 1)


def init_critic_params(key, state_dim, action_dim):
    """PyTorch nn.Linear-style init (U[-1/sqrt(fan_in), 1/sqrt(fan_in)]),
    stored in the kernel-friendly layout described above."""
    in_dim = state_dim + action_dim

    def linear(k, fan_in, fan_out):
        kw, kb = jax.random.split(k)
        bound = 1.0 / (fan_in ** 0.5)
        w = jax.random.uniform(kw, (fan_in, fan_out), jnp.float32, -bound, bound)
        b = jax.random.uniform(kb, (1, fan_out), jnp.float32, -bound, bound)
        return w, b

    k1, k2, k3 = jax.random.split(key, 3)
    w1, b1 = linear(k1, in_dim, HIDDEN)
    w2, b2 = linear(k2, HIDDEN, HIDDEN)
    w3, b3 = linear(k3, HIDDEN, 1)

    return dict(
        w1=w1.astype(jnp.bfloat16),   # (S+A, 256) bf16, fused fc1 weight
        b1=b1,                        # (1, 256) f32
        w2=w2.astype(jnp.bfloat16),   # (256, 256) bf16
        b2=b2,                        # (1, 256) f32
        w3=w3.T,                      # (1, 256) f32 row vector
        b3=b3.reshape(1),             # (1,) f32 scalar (SMEM)
    )


def critic_reference(state, action, params):
    """Pure-JAX reference using the same mixed-precision math as the kernel
    (bf16 MXU operands, f32 accumulation) for verification."""
    x = jnp.concatenate([state, action], axis=1)
    h1 = jnp.maximum(
        jnp.dot(x.astype(jnp.bfloat16), params["w1"],
                preferred_element_type=jnp.float32) + params["b1"], 0.0)
    h2 = jnp.maximum(
        jnp.dot(h1.astype(jnp.bfloat16), params["w2"],
                preferred_element_type=jnp.float32) + params["b2"], 0.0)
    return jnp.dot(h2, params["w3"].T) + params["b3"][0]


if __name__ == "__main__":
    state_dim, action_dim, batch = 16, 8, 8

    key = jax.random.PRNGKey(0)
    kp, ks, ka = jax.random.split(key, 3)
    params = init_critic_params(kp, state_dim, action_dim)
    state = jax.random.normal(ks, (batch, state_dim), jnp.float32)
    action = jax.random.normal(ka, (batch, action_dim), jnp.float32)

    q = critic_forward(state, action, params)
    jax.block_until_ready(q)

    q_ref = critic_reference(state, action, params)
    assert q.shape == (batch, 1)
    assert jnp.allclose(q, q_ref, atol=2e-3, rtol=2e-3), "mismatch vs reference"

    print("KERNEL_OK")
</pallas_src>

<mosaic_0001>
module attributes {stable_mosaic.version = 11 : i64} {
  func.func @_critic_kernel(%arg0: i32, %arg1: memref<8x16xf32, #tpu.memory_space<vmem>>, %arg2: memref<8x8xf32, #tpu.memory_space<vmem>>, %arg3: memref<24x256xbf16, #tpu.memory_space<vmem>>, %arg4: memref<1x256xf32, #tpu.memory_space<vmem>>, %arg5: memref<256x256xbf16, #tpu.memory_space<vmem>>, %arg6: memref<1x256xf32, #tpu.memory_space<vmem>>, %arg7: memref<1x256xf32, #tpu.memory_space<vmem>>, %arg8: memref<1xf32, #tpu.memory_space<smem>>, %arg9: memref<1x1x8xf32, #tpu.memory_space<vmem>>) attributes {dimension_semantics = [#tpu.dimension_semantics<parallel>], iteration_bounds = array<i64: 1>, scalar_prefetch = 0 : i64, scratch_operands = 0 : i64, tpu.core_type = #tpu.core_type<tc>, window_params = [{transform_indices = @transform_0, window_bounds = array<i64: 8, 16>}, {transform_indices = @transform_1, window_bounds = array<i64: 8, 8>}, {pipeline_mode = #tpu.pipeline_mode<synchronous>, transform_indices = @transform_2, window_bounds = array<i64: 24, 256>}, {pipeline_mode = #tpu.pipeline_mode<synchronous>, transform_indices = @transform_3, window_bounds = array<i64: 1, 256>}, {pipeline_mode = #tpu.pipeline_mode<synchronous>, transform_indices = @transform_4, window_bounds = array<i64: 256, 256>}, {pipeline_mode = #tpu.pipeline_mode<synchronous>, transform_indices = @transform_5, window_bounds = array<i64: 1, 256>}, {pipeline_mode = #tpu.pipeline_mode<synchronous>, transform_indices = @transform_6, window_bounds = array<i64: 1, 256>}, {transform_indices = @transform_7, window_bounds = array<i64: 1>}, {transform_indices = @transform_8, window_bounds = array<i64: 1, 1, 8>}]} {
    %c0 = arith.constant 0 : index
    %c0_0 = arith.constant 0 : index
    %0 = vector.load %arg1[%c0, %c0_0] : memref<8x16xf32, #tpu.memory_space<vmem>>, vector<8x16xf32>
    %c0_1 = arith.constant 0 : index
    %c0_2 = arith.constant 0 : index
    %1 = vector.load %arg2[%c0_1, %c0_2] : memref<8x8xf32, #tpu.memory_space<vmem>>, vector<8x8xf32>
    %2 = tpu.concatenate %0, %1 in 1 : vector<8x16xf32>, vector<8x8xf32> -> vector<8x24xf32>
    %3 = arith.truncf %2 : vector<8x24xf32> to vector<8x24xbf16>
    %c0_3 = arith.constant 0 : index
    %c0_4 = arith.constant 0 : index
    %4 = vector.load %arg3[%c0_3, %c0_4] : memref<24x256xbf16, #tpu.memory_space<vmem>>, vector<24x256xbf16>
    %cst = arith.constant dense<0.000000e+00> : vector<8x256xf32>
    %5 = tpu.matmul %3, %4, %cst {dimension_numbers = #tpu.dot_dimension_numbers<[1], [0], [0], [1], [0, 0, 1, 1], [], []>} : vector<8x24xbf16>, vector<24x256xbf16>, vector<8x256xf32> -> vector<8x256xf32>
    %c0_5 = arith.constant 0 : index
    %c0_6 = arith.constant 0 : index
    %6 = vector.load %arg4[%c0_5, %c0_6] : memref<1x256xf32, #tpu.memory_space<vmem>>, vector<1x256xf32>
    %7 = vector.broadcast %6 : vector<1x256xf32> to vector<8x256xf32>
    %8 = arith.addf %5, %7 : vector<8x256xf32>
    %cst_7 = arith.constant 0.000000e+00 : f32
    %9 = vector.broadcast %cst_7 : f32 to vector<8x256xf32>
    %10 = arith.maximumf %8, %9 : vector<8x256xf32>
    %11 = arith.truncf %10 : vector<8x256xf32> to vector<8x256xbf16>
    %c0_8 = arith.constant 0 : index
    %c0_9 = arith.constant 0 : index
    %12 = vector.load %arg5[%c0_8, %c0_9] : memref<256x256xbf16, #tpu.memory_space<vmem>>, vector<256x256xbf16>
    %cst_10 = arith.constant dense<0.000000e+00> : vector<8x256xf32>
    %13 = tpu.matmul %11, %12, %cst_10 {dimension_numbers = #tpu.dot_dimension_numbers<[1], [0], [0], [1], [0, 0, 1, 1], [], []>} : vector<8x256xbf16>, vector<256x256xbf16>, vector<8x256xf32> -> vector<8x256xf32>
    %c0_11 = arith.constant 0 : index
    %c0_12 = arith.constant 0 : index
    %14 = vector.load %arg6[%c0_11, %c0_12] : memref<1x256xf32, #tpu.memory_space<vmem>>, vector<1x256xf32>
    %15 = vector.broadcast %14 : vector<1x256xf32> to vector<8x256xf32>
    %16 = arith.addf %13, %15 : vector<8x256xf32>
    %cst_13 = arith.constant 0.000000e+00 : f32
    %17 = vector.broadcast %cst_13 : f32 to vector<8x256xf32>
    %18 = arith.maximumf %16, %17 : vector<8x256xf32>
    %c0_14 = arith.constant 0 : index
    %c0_15 = arith.constant 0 : index
    %19 = vector.load %arg7[%c0_14, %c0_15] : memref<1x256xf32, #tpu.memory_space<vmem>>, vector<1x256xf32>
    %cst_16 = arith.constant dense<0.000000e+00> : vector<1x8xf32>
    %20 = tpu.matmul %19, %18, %cst_16 {dimension_numbers = #tpu.dot_dimension_numbers<[1], [1], [0], [0], [0, 0, 1, 0], [], []>} : vector<1x256xf32>, vector<8x256xf32>, vector<1x8xf32> -> vector<1x8xf32>
    %c0_17 = arith.constant 0 : index
    %21 = memref.load %arg8[%c0_17] : memref<1xf32, #tpu.memory_space<smem>>
    %22 = vector.broadcast %21 : f32 to vector<1x8xf32>
    %23 = arith.addf %20, %22 : vector<1x8xf32>
    %24 = vector.shape_cast %23 : vector<1x8xf32> to vector<1x1x8xf32>
    %c0_18 = arith.constant 0 : index
    %c0_19 = arith.constant 0 : index
    %c0_20 = arith.constant 0 : index
    %25 = vector.load %arg9[%c0_18, %c0_19, %c0_20] : memref<1x1x8xf32, #tpu.memory_space<vmem>>, vector<1x1x8xf32>
    tpu.vector_store %arg9[%c0_18, %c0_19, %c0_20], %24 {strides = array<i32>} : memref<1x1x8xf32, #tpu.memory_space<vmem>>, vector<1x1x8xf32>,
    return
  }
  func.func @transform_0(%arg0: i32) -> (i32, i32) {
    %c0_i32 = arith.constant 0 : i32
    %c0_i32_0 = arith.constant 0 : i32
    return %arg0, %c0_i32 : i32, i32
  }
  func.func @transform_1(%arg0: i32) -> (i32, i32) {
    %c0_i32 = arith.constant 0 : i32
    %c0_i32_0 = arith.constant 0 : i32
    return %arg0, %c0_i32 : i32, i32
  }
  func.func @transform_2(%arg0: i32) -> (i32, i32) {
    %c0_i32 = arith.constant 0 : i32
    %c0_i32_0 = arith.constant 0 : i32
    %c0_i32_1 = arith.constant 0 : i32
    return %c0_i32, %c0_i32_0 : i32, i32
  }
  func.func @transform_3(%arg0: i32) -> (i32, i32) {
    %c0_i32 = arith.constant 0 : i32
    %c0_i32_0 = arith.constant 0 : i32
    %c0_i32_1 = arith.constant 0 : i32
    return %c0_i32, %c0_i32_0 : i32, i32
  }
  func.func @transform_4(%arg0: i32) -> (i32, i32) {
    %c0_i32 = arith.constant 0 : i32
    %c0_i32_0 = arith.constant 0 : i32
    %c0_i32_1 = arith.constant 0 : i32
    return %c0_i32, %c0_i32_0 : i32, i32
  }
  func.func @transform_5(%arg0: i32) -> (i32, i32) {
    %c0_i32 = arith.constant 0 : i32
    %c0_i32_0 = arith.constant 0 : i32
    %c0_i32_1 = arith.constant 0 : i32
    return %c0_i32, %c0_i32_0 : i32, i32
  }
  func.func @transform_6(%arg0: i32) -> (i32, i32) {
    %c0_i32 = arith.constant 0 : i32
    %c0_i32_0 = arith.constant 0 : i32
    %c0_i32_1 = arith.constant 0 : i32
    return %c0_i32, %c0_i32_0 : i32, i32
  }
  func.func @transform_7(%arg0: i32) -> i32 {
    %c0_i32 = arith.constant 0 : i32
    %c0_i32_0 = arith.constant 0 : i32
    return %c0_i32 : i32
  }
  func.func @transform_8(%arg0: i32) -> (i32, i32, i32) {
    %c0_i32 = arith.constant 0 : i32
    %c0_i32_0 = arith.constant 0 : i32
    %c0_i32_1 = arith.constant 0 : i32
    return %arg0, %c0_i32, %c0_i32_0 : i32, i32, i32
  }
}

</mosaic_0001>

<bundles_post_ra>
// kernel: tpu_custom_call.1
= control target key start
LH: loop header
LB: loop body
LE: loop exit
PB: predicated region body
PF: predicated region fallthrough
CT: control target
= control target key end

     0   :  { %14 = vsyncpa [#allocation4], 0  ;;  %s817_s0 = inlined_call_operand.hbm [shape: f32[8,16], index: 0, kind: input, shape index: {}]   ;;  %s818_s1 = inlined_call_operand.hbm [shape: f32[8,8], index: 1, kind: input, shape index: {}]   ;;  %s819_s2 = inlined_call_operand.hbm [shape: bf16[24,256], index: 2, kind: input, shape index: {}]   ;;  %s820_s3 = inlined_call_operand.vmem [shape: f32[1,256], index: 3, kind: input, shape index: {}]   ;;  %s821_s4 = inlined_call_operand.hbm [shape: bf16[256,256], index: 4, kind: input, shape index: {}]   ;;  %s822_s5 = inlined_call_operand.vmem [shape: f32[1,256], index: 5, kind: input, shape index: {}]   ;;  %s823_s6 = inlined_call_operand.vmem [shape: f32[1,256], index: 6, kind: input, shape index: {}]   ;;  %s824_s7 = inlined_call_operand.<no memory space> [shape: f32[1], index: 7, kind: input, shape index: {}]   ;;  %s825_s8 = inlined_call_operand.hbm [shape: f32[1,1,8], index: 8, kind: output, shape index: {}]  }
   0x1   :  { %15 = vsyncpa [#allocation7], 0 }
   0x2   :  { %16 = vsyncpa [#allocation10], 0 }
   0x3   :  { %17 = vsyncpa [#allocation5], 0  ;;  %s736_s27 = smov [#allocation6]   ;;  %s737_s29 = smov [#allocation3]  }
   0x4   :  { %s34_s28 = sshll.u32 %s736_s27, 4  ;;  %s24_s30 = sshll.u32 %s737_s29, 4  ;;  %s35_s28 = int_to_ptr.vmem [resolvable:$true] %s34_s28  ;;  %s25_s30 = int_to_ptr.vmem [resolvable:$true] %s24_s30 }
   0x5   :  { %s636_s9 = scalar_lea.vmem %s35_s28, 128  ;;  %p641_p1 = scmp.lt.s32.totalorder %s35_s28, %s35_s28 }
   0x6   :  { %p637_p0 = scmp.ne.s32.totalorder %s35_s28, %s636_s9  ;;  %p642_p2 = scmp.lt.s32.totalorder %s636_s9, %s636_s9 }
   0x8   :  { %p643_p3 = por %p642_p2, %p641_p1 }
   0xa   :  { %p644_p4 = pnand %p643_p3, %p637_p0 }
   0xc   :  { %647 = shalt.err (!%p644_p4)
}
   0xd   :  { %37 = dma.hbm_to_vmem [thread:$0]  %s818_s1, 128, %s35_s28, [#allocation7]  }
   0xe   :  { %s656_s12 = scalar_lea.vmem %s25_s30, 128  ;;  %p661_p6 = scmp.lt.s32.totalorder %s25_s30, %s25_s30 }
   0xf   :  { %p657_p5 = scmp.ne.s32.totalorder %s25_s30, %s656_s12  ;;  %p662_p7 = scmp.lt.s32.totalorder %s656_s12, %s656_s12 }
  0x11   :  { %p663_p8 = por %p662_p7, %p661_p6 }
  0x13   :  { %p664_p9 = pnand %p663_p8, %p657_p5 }
  0x15   :  { %667 = shalt.err (!%p664_p9)
}
  0x16   :  { %27 = dma.hbm_to_vmem [thread:$0]  %s817_s0, 128, %s25_s30, [#allocation4]  }
  0x17   :  { %s738_s15 = smov [#allocation8]  }
  0x18   :  { %s43_s16 = sshll.u32 %s738_s15, 4  ;;  %s44_s16 = int_to_ptr.vmem [resolvable:$true] %s43_s16 }
  0x19   :  { %s676_s17 = scalar_lea.vmem %s44_s16, 384  ;;  %p681_p11 = scmp.lt.s32.totalorder %s44_s16, %s44_s16 }
  0x1a   :  { %p677_p10 = scmp.ne.s32.totalorder %s44_s16, %s676_s17  ;;  %p682_p12 = scmp.lt.s32.totalorder %s676_s17, %s676_s17 }
  0x1c   :  { %p683_p13 = por %p682_p12, %p681_p11 }
  0x1e   :  { %p684_p0 = pnand %p683_p13, %p677_p10 }
  0x20   :  { %687 = shalt.err (!%p684_p0)
}
  0x21   :  { %s739_s1 = smov 128   ;;  %s740_s18 = smov 8  }
  0x22   :  { %49 = dma.hbm_to_vmem [thread:$0]  %s819_s2, 384, %s44_s16, [#allocation7], %s739_s1, %s739_s1, %s740_s18  }
  0x23   :  { %s741_s21 = smov [#allocation9]  }
  0x24   :  { %s57_s22 = sshll.u32 %s741_s21, 4  ;;  %s58_s22 = int_to_ptr.vmem [resolvable:$true] %s57_s22 }
  0x25   :  { %s696_s0 = scalar_lea.vmem %s58_s22, 4096  ;;  %p701_p2 = scmp.lt.s32.totalorder %s58_s22, %s58_s22 }
  0x26   :  { %p697_p1 = scmp.ne.s32.totalorder %s58_s22, %s696_s0  ;;  %p702_p3 = scmp.lt.s32.totalorder %s696_s0, %s696_s0 }
  0x28   :  { %p703_p4 = por %p702_p3, %p701_p2 }
  0x2a   :  { %p704_p5 = pnand %p703_p4, %p697_p1 }
  0x2c   :  { %707 = shalt.err (!%p704_p5)
}
  0x2d   :  { %63 = dma.hbm_to_vmem [thread:$0]  %s821_s4, 4096, %s58_s22, [#allocation10], %s739_s1, %s739_s1, %s740_s18  }
  0x2e   :  { %728 = dma.done.wait [#allocation4], 128  }
  0x2f   :  { %729 = vsyncadd [#allocation4], 4294967168 }
  0x30   :  { %730 = dma.done.wait [#allocation7], 512  }
  0x31   :  { %731 = vsyncadd [#allocation7], 4294966784 }
  0x32   :  { %732 = dma.done.wait [#allocation10], 4096  }
  0x33   :  { %733 = vsyncadd [#allocation10], 4294963200  ;;  %v742_v0 = vmov 0   ;;  %v84_v1 = vld [vmem:[#allocation6] sm:$0xff]  ;;  %v94_v2 = vld [vmem:[#allocation8 + $0x10] sm:$0xff]  ;;  %vm126_vm0 = vcmask 1043456   ;;  %v97_v44 = vlaneseq }
  0x34   :  { %165 = vmatprep.mubr.bf16.mxu0 %v742_v0  ;;  %s743_s2 = smov 16   ;;  %v531_v3 = vcombine.high %v94_v2, %v94_v2  ;;  %v530_v4 = vcombine.low %v94_v2, %v94_v2  ;;  %v577_v5 = vld [vmem:[#allocation8 + $0x4] ss:$8 sps:$4 sm:$0xff]   ;;  %v582_v8 = vld [vmem:[#allocation9 + $0x70] ss:$8 sps:$4 sm:$0xff]   ;;  %vm89_vm1 = vcmask 130048  }
  0x35   :  { %86 = vrot.lane.b32.xlu0 %v84_v1, %s743_s2  ;;  %v580_v7 = vld [vmem:[#allocation9 + $0x74] ss:$8 sps:$4 sm:$0xff]   ;;  %v579_v9 = vld [vmem:[#allocation8] ss:$8 sps:$4 sm:$0xff]   ;;  %v583_v10 = vld [vmem:[#allocation9 + $0x64] ss:$8 sps:$4 sm:$0xff]  }
  0x36   :  { %532 = vmatprep.subr.msk.bf16.mxu0 %vm126_vm0, %v531_v3  ;;  %v128_v6 = vsel %vm126_vm0, %v530_v4, 0  ;;  %382 = vmatprep.subr.bf16.mxu1 %v580_v7  ;;  %v585_v11 = vld [vmem:[#allocation9 + $0x60] ss:$8 sps:$4 sm:$0xff]   ;;  %v586_v12 = vld [vmem:[#allocation9 + $0x54] ss:$8 sps:$4 sm:$0xff]   ;;  %vm122_vm2 = vcmask 195584  }
  0x37   :  { %146 = vmatpush1.bf16.msra.mxu0 %v128_v6  ;;  %383 = vmatpush1.bf16.msra.mxu1 %v582_v8  ;;  %v588_v13 = vld [vmem:[#allocation9 + $0x50] ss:$8 sps:$4 sm:$0xff]   ;;  %v589_v14 = vld [vmem:[#allocation9 + $0x44] ss:$8 sps:$4 sm:$0xff]   ;;  %v591_v15 = vld [vmem:[#allocation9 + $0x40] ss:$8 sps:$4 sm:$0xff]  }
  0x38   :  { %147 = vmatprep.subr.bf16.mxu0 %v577_v5  ;;  %384 = vmatprep.subr.bf16.mxu1 %v583_v10  ;;  %v592_v16 = vld [vmem:[#allocation9 + $0x34] ss:$8 sps:$4 sm:$0xff]   ;;  %v594_v17 = vld [vmem:[#allocation9 + $0x30] ss:$8 sps:$4 sm:$0xff]   ;;  %v595_v18 = vld [vmem:[#allocation9 + $0x24] ss:$8 sps:$4 sm:$0xff]  }
  0x39   :  { %v597_v19 = vld [vmem:[#allocation9 + $0x20] ss:$8 sps:$4 sm:$0xff]   ;;  %v598_v20 = vld [vmem:[#allocation9 + $0x14] ss:$8 sps:$4 sm:$0xff]   ;;  %v600_v21 = vld [vmem:[#allocation9 + $0x10] ss:$8 sps:$4 sm:$0xff]  }
  0x3a   :  { %v601_v22 = vld [vmem:[#allocation9 + $0x4] ss:$8 sps:$4 sm:$0xff]   ;;  %v603_v23 = vld [vmem:[#allocation9] ss:$8 sps:$4 sm:$0xff]   ;;  %v604_v24 = vld [vmem:[#allocation9 + $0xf4] ss:$8 sps:$4 sm:$0xff]  }
  0x3b   :  { %148 = vmatpush1.bf16.msra.mxu0 %v579_v9  ;;  %385 = vmatpush1.bf16.msra.mxu1 %v585_v11  ;;  %v606_v25 = vld [vmem:[#allocation9 + $0xf0] ss:$8 sps:$4 sm:$0xff]   ;;  %v607_v26 = vld [vmem:[#allocation9 + $0xe4] ss:$8 sps:$4 sm:$0xff]   ;;  %v609_v27 = vld [vmem:[#allocation9 + $0xe0] ss:$8 sps:$4 sm:$0xff]   ;;  %v427_v11 = vstv %s824_s7 }
  0x3c   :  { %386 = vmatprep.subr.bf16.mxu1 %v586_v12  ;;  %v610_v28 = vld [vmem:[#allocation9 + $0xd4] ss:$8 sps:$4 sm:$0xff]   ;;  %v612_v29 = vld [vmem:[#allocation9 + $0xd0] ss:$8 sps:$4 sm:$0xff]   ;;  %v613_v30 = vld [vmem:[#allocation9 + $0xc4] ss:$8 sps:$4 sm:$0xff]  }
  0x3d   :  { %v615_v31 = vld [vmem:[#allocation9 + $0xc0] ss:$8 sps:$4 sm:$0xff]   ;;  %v616_v32 = vld [vmem:[#allocation9 + $0xb4] ss:$8 sps:$4 sm:$0xff]   ;;  %v618_v33 = vld [vmem:[#allocation9 + $0xb0] ss:$8 sps:$4 sm:$0xff]  }
  0x3e   :  { %v619_v34 = vld [vmem:[#allocation9 + $0xa4] ss:$8 sps:$4 sm:$0xff]   ;;  %v621_v35 = vld [vmem:[#allocation9 + $0xa0] ss:$8 sps:$4 sm:$0xff]   ;;  %v83_v36 = vld [vmem:[#allocation3] sm:$0xff]  ;;  %v98_v45 = vshrl.u32 %v97_v44, 7 }
  0x3f   :  { %387 = vmatpush1.bf16.msra.mxu1 %v588_v13  ;;  %v622_v40 = vld [vmem:[#allocation9 + $0x94] ss:$8 sps:$4 sm:$0xff]   ;;  %v624_v41 = vld [vmem:[#allocation9 + $0x90] ss:$8 sps:$4 sm:$0xff]   ;;  %v625_v42 = vld [vmem:[#allocation9 + $0x84] ss:$8 sps:$4 sm:$0xff]  }
  0x40   :  { %388 = vmatprep.subr.bf16.mxu1 %v589_v14  ;;  %v627_v43 = vld [vmem:[#allocation9 + $0x80] ss:$8 sps:$4 sm:$0xff]   ;;  %v99_v46 = vsub.s32 0, %v98_v45  ;;  %v95_v47 = vld [vmem:[%s820_s3] sm:$0x3]  ;;  %v103_v48 = vsub.s32 1, %v98_v45 }
  0x41   :  { %v425_v61 = vld [vmem:[%s823_s6] sm:$0x3]  ;;  %s744_s30 = smov [#allocation11]   ;;  %vm509_vm3 = vcmask 57344  }
  0x42   :  { %v100_v49 = vrot.slane %v95_v47, %v99_v46  ;;  %v104_v50 = vrot.slane %v95_v47, %v103_v48  ;;  %v436_v62 = vrot.slane %v425_v61, %v103_v48  ;;  %v210_v63 = vld [vmem:[%s822_s5] sm:$0x3]  ;;  %v432_v10 = vrot.slane %v425_v61, %v99_v46  ;;  %s517_s5 = sshll.u32 %s744_s30, 4  ;;  %s518_s5 = int_to_ptr.vmem [resolvable:$true] %s517_s5 }
  0x43   :  { %389 = vmatpush1.bf16.msra.mxu1 %v591_v15  ;;  %v215_v0 = vrot.slane %v210_v63, %v99_v46  ;;  %v219_v1 = vrot.slane %v210_v63, %v103_v48  ;;  %s708_s9 = scalar_lea.vmem %s518_s5, 16  ;;  %s712_s10 = scalar_lea.vmem %s518_s5, 32 }
  0x44   :  { %390 = vmatprep.subr.bf16.mxu1 %v592_v16  ;;  %p709_p6 = scmp.ne.s32.totalorder %s518_s5, %s708_s9  ;;  %p713_p7 = scmp.lt.s32.totalorder %s518_s5, %s518_s5 }
  0x45   :  { %p714_p8 = scmp.lt.s32.totalorder %s712_s10, %s708_s9 }
  0x47   :  { %391 = vmatpush1.bf16.msra.mxu1 %v594_v17  ;;  %p715_p9 = por %p714_p8, %p713_p7 }
  0x48   :  { %392 = vmatprep.subr.bf16.mxu1 %v595_v18 }
  0x49   :  { %p716_p10 = pnand %p715_p9, %p709_p6 }
  0x4b   :  { %393 = vmatpush1.bf16.msra.mxu1 %v597_v19 }
  0x4c   :  { %394 = vmatprep.subr.bf16.mxu1 %v598_v20 }
  0x4f   :  { %395 = vmatpush1.bf16.msra.mxu1 %v600_v21 }
  0x50   :  { %396 = vmatprep.subr.bf16.mxu1 %v601_v22 }
  0x53   :  { %397 = vmatpush1.bf16.msra.mxu1 %v603_v23 }
  0x54   :  { %398 = vmatprep.subr.bf16.mxu1 %v604_v24 }
  0x57   :  { %399 = vmatpush2.bf16.msra.mxu1 %v606_v25 }
  0x58   :  { %400 = vmatprep.subr.bf16.mxu1 %v607_v26 }
  0x5b   :  { %401 = vmatpush2.bf16.msra.mxu1 %v609_v27 }
  0x5c   :  { %402 = vmatprep.subr.bf16.mxu1 %v610_v28 }
  0x5f   :  { %403 = vmatpush2.bf16.msra.mxu1 %v612_v29 }
  0x60   :  { %404 = vmatprep.subr.bf16.mxu1 %v613_v30 }
  0x63   :  { %405 = vmatpush2.bf16.msra.mxu1 %v615_v31 }
  0x64   :  { %406 = vmatprep.subr.bf16.mxu1 %v616_v32 }
  0x67   :  { %407 = vmatpush2.bf16.msra.mxu1 %v618_v33 }
  0x68   :  { %408 = vmatprep.subr.bf16.mxu1 %v619_v34 }
  0x6b   :  { %409 = vmatpush2.bf16.msra.mxu1 %v621_v35 }
  0x6c   :  { %410 = vmatprep.subr.bf16.mxu1 %v622_v40 }
  0x6f   :  { %411 = vmatpush2.bf16.msra.mxu1 %v624_v41 }
  0x70   :  { %412 = vmatprep.subr.bf16.mxu1 %v625_v42 }
  0x73   :  { %413 = vmatpush2.bf16.msra.mxu1 %v627_v43 }
  0xa7   :  { %v87_v37 = vpop.permute.xlu0 %86 }
  0xa8   :  { %v90_v38 = vsel %vm89_vm1, %v83_v36, %v87_v37 }
  0xa9   :  { %v91_v39 = vpack.c.bf16 %v90_v38, %v90_v38 }
  0xab   :  { %533 = vmatmul.mubr.msk.bf16.vlgmr.msra.gmra.mxu0 %vm122_vm2, %v91_v39 }
  0xac   :  { %503 = vmatprep.mubr.f32.mxu0 %v436_v62 }
 0x16b   :  { %v167_v51 = vpop.f32.mrf.mxu0 }
 0x16c   :  { %v168_v52 = vadd.f32 %v167_v51, %v100_v49 }
 0x16d   :  { %v169_v53 = vpop.f32.mrf.mxu0 }
 0x16e   :  { %v170_v54 = vadd.f32 %v169_v53, %v104_v50  ;;  %v174_v55 = vmax.f32 %v168_v52, 0.0 }
 0x16f   :  { %v171_v56 = vpop.f32.mrf.mxu0 }
 0x170   :  { %v175_v57 = vmax.f32 %v170_v54, 0.0  ;;  %v176_v60 = vpack.c.bf16 %v174_v55, %v174_v55 }
 0x171   :  { %v172_v58 = vpop.f32.mrf.mxu0 }
 0x172   :  { %v177_v59 = vpack.c.bf16 %v175_v57, %v175_v57 }
 0x174   :  { %414 = vmatprep.mubr.bf16.mxu1 %v177_v59 }
 0x175   :  { %415 = vmatmul.mubr.bf16.vlgmr.msra.gmra.mxu1 %v176_v60 }
 0x235   :  { %v416_v2 = vpop.f32.mrf.mxu1 }
 0x236   :  { %v417_v3 = vadd.f32 %v416_v2, %v215_v0 }
 0x237   :  { %v418_v4 = vpop.f32.mrf.mxu1 }
 0x238   :  { %v419_v5 = vadd.f32 %v418_v4, %v219_v1  ;;  %v423_v8 = vmax.f32 %v417_v3, 0.0 }
 0x239   :  { %v420_v6 = vpop.f32.mrf.mxu1 }
 0x23a   :  { %v424_v7 = vmax.f32 %v419_v5, 0.0 }
 0x23b   :  { %v421_v9 = vpop.f32.mrf.mxu1 }
 0x23c   :  { %469 = vmatprep.subr.mxu0 %v424_v7 }
 0x23d   :  { %470 = vmatpush1.xpose.msra.mxu0 %v423_v8 }
 0x240   :  { %504 = vmatmul.mubr.f32.vlgmr.msra.gmra.mxu0 %v432_v10 }
 0x300   :  { %v505_v12 = vpop.f32.mrf.mxu0 }
 0x301   :  { %v506_v13 = vadd.f32 %v505_v12, %v427_v11 }
 0x302   :  { %v507_v14 = vpop.f32.mrf.mxu0 }
 0x303   :  { %510 = vst.msk [vmem:[#allocation11] sm:$0x1] %vm509_vm3, %v506_v13 }
 0x304   :  { %719 = shalt.err (!%p716_p10)
}
 0x305   :  { %520 = dma.vmem_to_hbm [thread:$0]  %s518_s5, 16, %s825_s8, [#allocation5]  }
 0x306   :  { %734 = dma.done.wait [#allocation5], 16  }
 0x307   :  { %735 = vsyncadd [#allocation5], 4294967280 }
 0x308   :  { %524 = vsyncpa [#allocation4], 1 }
 0x309   :  { %525 = vsyncpa [#allocation7], 1 }
 0x30a   :  { %526 = vsyncpa [#allocation10], 1 }
 0x30b   :  { %527 = vsyncpa [#allocation5], 1 }

</bundles_post_ra>
